<compile_context>
chip_gen: v6e
topology: v6e:2x2x1
jax: 0.10.0
libtpu: 0.0.40
codegen_flags: <defaults>
</compile_context>

<pallas_src>
import jax
import jax.numpy as jnp
from jax.experimental import pallas as pl
from jax.experimental.pallas import tpu as pltpu


# ------------------------------- kernels -----------------------------------

def maxpool_kernel(x_ref, pooled_ref):
    # x_ref:      (C, hw_tile)  one batch element, one spatial tile
    # pooled_ref: (C, 1)        running max (resident across the HW-tile axis)
    t = pl.program_id(1)
    tile_max = jnp.max(x_ref[...], axis=-1, keepdims=True).astype(pooled_ref.dtype)

    @pl.when(t == 0)
    def _():
        pooled_ref[...] = tile_max

    @pl.when(t != 0)
    def _():
        pooled_ref[...] = jnp.maximum(pooled_ref[...], tile_max)


def gate_kernel(pooled_ref, wt_ref, b_ref, gate_ref):
    # pooled_ref: (B, C)   pooled features for ALL batch elements
    # wt_ref:     (C, C)   1x1-conv weight, already transposed to [in, out]
    # b_ref:      (1, C)   1x1-conv bias
    # gate_ref:   (B, C)   sigmoid gates
    y = jnp.dot(pooled_ref[...].astype(jnp.float32),
                wt_ref[...].astype(jnp.float32),
                preferred_element_type=jnp.float32) + b_ref[...]
    gate_ref[...] = 1.0 / (1.0 + jnp.exp(-y))


def gate_mul_kernel(x_ref, g_ref, o_ref):
    # x_ref: (C, hw_tile), g_ref: (C, 1), o_ref: (C, hw_tile)
    # Multiply in x's native dtype (no full-block upcast copy).
    o_ref[...] = x_ref[...] * g_ref[...].astype(x_ref.dtype)


# ------------------------------- wrapper ------------------------------------

_VMEM_LIMIT_BYTES = 32 * 1024 * 1024      # explicit, works on v5e/v6e/v7x
_TARGET_BLOCK_BYTES = 4 << 20             # ~4 MiB per (C, hw_tile) block


def _pick_hw_tile(HW, C, dtype_bytes):
    """Largest lane-dense (multiple-of-128) HW tile that divides HW and keeps
    a (C, hw_tile) block under the target size. Falls back to the full extent
    (legal: equals the array dim) when HW is not a multiple of 128."""
    if HW % 128 != 0:
        return HW
    max_lanes = _TARGET_BLOCK_BYTES // max(C * dtype_bytes, 1)
    max_lanes = max(128, (max_lanes // 128) * 128)
    tile = min(HW, max_lanes)
    tile = max(128, (tile // 128) * 128)
    while HW % tile != 0:
        tile -= 128
    return tile


def se_layer(x, weight, bias):
    """x: (B, C, H, W); weight: (C, C) [out, in]; bias: (C,). Returns (B, C, H, W)."""
    B, C, H, W = x.shape
    HW = H * W
    hw_tile = _pick_hw_tile(HW, C, jnp.dtype(x.dtype).itemsize)
    n_hw = HW // hw_tile

    x_flat = x.reshape(B, C, HW)
    wt = weight.T                      # (C_in, C_out) so the kernel does pooled @ wt
    bias2d = bias.reshape(1, C)

    # ---- Pass 1: tiled global max-pool -> pooled (B, C, 1) -----------------
    pooled = pl.pallas_call(
        maxpool_kernel,
        out_shape=jax.ShapeDtypeStruct((B, C, 1), jnp.float32),
        grid_spec=pltpu.PrefetchScalarGridSpec(
            num_scalar_prefetch=0,
            grid=(B, n_hw),
            in_specs=[pl.BlockSpec((None, C, hw_tile), lambda b, t: (b, 0, t))],
            out_specs=pl.BlockSpec((None, C, 1), lambda b, t: (b, 0, 0)),
        ),
        compiler_params=pltpu.CompilerParams(
            dimension_semantics=("parallel", "arbitrary"),
            vmem_limit_bytes=_VMEM_LIMIT_BYTES,
        ),
    )(x_flat)

    # ---- Squeeze: one batched (B,C)@(C,C) matmul + bias + sigmoid ----------
    gates = pl.pallas_call(
        gate_kernel,
        out_shape=jax.ShapeDtypeStruct((B, C), jnp.float32),
    )(pooled.reshape(B, C), wt, bias2d)

    # ---- Pass 2: elementwise gate multiply (output aliased onto x) ---------
    out_flat = pl.pallas_call(
        gate_mul_kernel,
        out_shape=jax.ShapeDtypeStruct((B, C, HW), x.dtype),
        grid_spec=pltpu.PrefetchScalarGridSpec(
            num_scalar_prefetch=0,
            grid=(B, n_hw),
            in_specs=[
                pl.BlockSpec((None, C, hw_tile), lambda b, t: (b, 0, t)),
                pl.BlockSpec((None, C, 1), lambda b, t: (b, 0, 0)),
            ],
            out_specs=pl.BlockSpec((None, C, hw_tile), lambda b, t: (b, 0, t)),
        ),
        input_output_aliases={0: 0},
        compiler_params=pltpu.CompilerParams(
            dimension_semantics=("parallel", "parallel"),
            vmem_limit_bytes=_VMEM_LIMIT_BYTES,
        ),
    )(x_flat, gates.reshape(B, C, 1))

    return out_flat.reshape(B, C, H, W)


def se_layer_ref(x, weight, bias):
    """Pure-JAX reference mirroring the PyTorch forward."""
    pooled = jnp.max(x, axis=(2, 3), keepdims=True)                 # (B,C,1,1)
    y = jnp.einsum("oi,bikl->bokl", weight, pooled) + bias[None, :, None, None]
    gate = jax.nn.sigmoid(y)
    return x * gate


# --------------------------------- demo -------------------------------------

if __name__ == "__main__":
    B, C, H, W = 2, 4, 16, 16

    key = jax.random.PRNGKey(0)
    kx, kw, kb = jax.random.split(key, 3)

    x = jax.random.normal(kx, (B, C, H, W), dtype=jnp.float32)
    # deterministic 1x1-conv parameters (Conv2d(C, C, kernel_size=1))
    weight = jax.random.normal(kw, (C, C), dtype=jnp.float32) * 0.1
    bias = jax.random.normal(kb, (C,), dtype=jnp.float32) * 0.1

    ref = se_layer_ref(x, weight, bias)

    out = jax.jit(se_layer)(x, weight, bias)
    out = jax.block_until_ready(out)

    assert jnp.allclose(out, ref, atol=1e-5, rtol=1e-5), "mismatch vs reference"

    print("KERNEL_OK")
</pallas_src>

<mosaic_0001>
module attributes {stable_mosaic.version = 11 : i64} {
  func.func @maxpool_kernel(%arg0: i32, %arg1: i32, %arg2: memref<1x4x256xf32, #tpu.memory_space<vmem>>, %arg3: memref<1x4x1xf32, #tpu.memory_space<vmem>>) attributes {dimension_semantics = [#tpu.dimension_semantics<parallel>, #tpu.dimension_semantics<arbitrary>], iteration_bounds = array<i64: 2, 1>, scalar_prefetch = 0 : i64, scratch_operands = 0 : i64, tpu.core_type = #tpu.core_type<tc>, window_params = [{transform_indices = @transform_0, window_bounds = array<i64: 1, 4, 256>}, {transform_indices = @transform_1, window_bounds = array<i64: 1, 4, 1>}]} {
    %c0 = arith.constant 0 : index
    %c0_0 = arith.constant 0 : index
    %c0_1 = arith.constant 0 : index
    %0 = vector.load %arg2[%c0, %c0_0, %c0_1] : memref<1x4x256xf32, #tpu.memory_space<vmem>>, vector<1x4x256xf32>
    %1 = vector.shape_cast %0 : vector<1x4x256xf32> to vector<4x256xf32>
    %cst = arith.constant dense<0xFF800000> : vector<4xf32>
    %2 = vector.multi_reduction <maximumf>, %1, %cst [1] : vector<4x256xf32> to vector<4xf32>
    %3 = vector.shape_cast %2 : vector<4xf32> to vector<4x1xf32>
    %c0_i32 = arith.constant 0 : i32
    %4 = arith.cmpi eq, %arg1, %c0_i32 : i32
    %5 = arith.extui %4 : i1 to i32
    %c0_i32_2 = arith.constant 0 : i32
    %6 = arith.cmpi ne, %5, %c0_i32_2 : i32
    scf.if %6 {
      %c0_5 = arith.constant 0 : index
      %c0_6 = arith.constant 0 : index
      %c0_7 = arith.constant 0 : index
      %10 = vector.load %arg3[%c0_5, %c0_6, %c0_7] : memref<1x4x1xf32, #tpu.memory_space<vmem>>, vector<1x4x1xf32>
      %11 = vector.shape_cast %10 : vector<1x4x1xf32> to vector<4x1xf32>
      %12 = vector.shape_cast %3 : vector<4x1xf32> to vector<1x4x1xf32>
      tpu.vector_store %arg3[%c0_5, %c0_6, %c0_7], %12 {strides = array<i32>} : memref<1x4x1xf32, #tpu.memory_space<vmem>>, vector<1x4x1xf32>,
    } else {
    }
    %c0_i32_3 = arith.constant 0 : i32
    %7 = arith.cmpi ne, %arg1, %c0_i32_3 : i32
    %8 = arith.extui %7 : i1 to i32
    %c0_i32_4 = arith.constant 0 : i32
    %9 = arith.cmpi ne, %8, %c0_i32_4 : i32
    scf.if %9 {
      %c0_5 = arith.constant 0 : index
      %c0_6 = arith.constant 0 : index
      %c0_7 = arith.constant 0 : index
      %10 = vector.load %arg3[%c0_5, %c0_6, %c0_7] : memref<1x4x1xf32, #tpu.memory_space<vmem>>, vector<1x4x1xf32>
      %11 = vector.shape_cast %10 : vector<1x4x1xf32> to vector<4x1xf32>
      %12 = arith.maximumf %11, %3 : vector<4x1xf32>
      %c0_8 = arith.constant 0 : index
      %c0_9 = arith.constant 0 : index
      %c0_10 = arith.constant 0 : index
      %13 = vector.load %arg3[%c0_8, %c0_9, %c0_10] : memref<1x4x1xf32, #tpu.memory_space<vmem>>, vector<1x4x1xf32>
      %14 = vector.shape_cast %13 : vector<1x4x1xf32> to vector<4x1xf32>
      %15 = vector.shape_cast %12 : vector<4x1xf32> to vector<1x4x1xf32>
      tpu.vector_store %arg3[%c0_8, %c0_9, %c0_10], %15 {strides = array<i32>} : memref<1x4x1xf32, #tpu.memory_space<vmem>>, vector<1x4x1xf32>,
    } else {
    }
    return
  }
  func.func @transform_0(%arg0: i32, %arg1: i32) -> (i32, i32, i32) {
    %c0_i32 = arith.constant 0 : i32
    %c0_i32_0 = arith.constant 0 : i32
    return %arg0, %c0_i32, %arg1 : i32, i32, i32
  }
  func.func @transform_1(%arg0: i32, %arg1: i32) -> (i32, i32, i32) {
    %c0_i32 = arith.constant 0 : i32
    %c0_i32_0 = arith.constant 0 : i32
    %c0_i32_1 = arith.constant 0 : i32
    return %arg0, %c0_i32, %c0_i32_0 : i32, i32, i32
  }
}

module attributes {stable_mosaic.version = 11 : i64} {
  func.func @gate_kernel(%arg0: memref<2x4xf32, #tpu.memory_space<vmem>>, %arg1: memref<4x4xf32, #tpu.memory_space<vmem>>, %arg2: memref<1x4xf32, #tpu.memory_space<vmem>>, %arg3: memref<2x4xf32, #tpu.memory_space<vmem>>) attributes {dimension_semantics = [], scalar_prefetch = 0 : i64, scratch_operands = 0 : i64, tpu.core_type = #tpu.core_type<tc>} {
    %c0 = arith.constant 0 : index
    %c0_0 = arith.constant 0 : index
    %0 = vector.load %arg0[%c0, %c0_0] : memref<2x4xf32, #tpu.memory_space<vmem>>, vector<2x4xf32>
    %c0_1 = arith.constant 0 : index
    %c0_2 = arith.constant 0 : index
    %1 = vector.load %arg1[%c0_1, %c0_2] : memref<4x4xf32, #tpu.memory_space<vmem>>, vector<4x4xf32>
    %cst = arith.constant dense<0.000000e+00> : vector<2x4xf32>
    %2 = tpu.matmul %0, %1, %cst {dimension_numbers = #tpu.dot_dimension_numbers<[1], [0], [0], [1], [0, 0, 1, 1], [], []>} : vector<2x4xf32>, vector<4x4xf32>, vector<2x4xf32> -> vector<2x4xf32>
    %c0_3 = arith.constant 0 : index
    %c0_4 = arith.constant 0 : index
    %3 = vector.load %arg2[%c0_3, %c0_4] : memref<1x4xf32, #tpu.memory_space<vmem>>, vector<1x4xf32>
    %4 = vector.broadcast %3 : vector<1x4xf32> to vector<2x4xf32>
    %5 = arith.addf %2, %4 : vector<2x4xf32>
    %cst_5 = arith.constant 0.000000e+00 : f32
    %6 = vector.broadcast %cst_5 : f32 to vector<2x4xf32>
    %7 = arith.subf %6, %5 : vector<2x4xf32>
    %8 = math.exp %7 : vector<2x4xf32>
    %cst_6 = arith.constant 1.000000e+00 : f32
    %9 = vector.broadcast %cst_6 : f32 to vector<2x4xf32>
    %10 = arith.addf %9, %8 : vector<2x4xf32>
    %cst_7 = arith.constant 1.000000e+00 : f32
    %11 = vector.broadcast %cst_7 : f32 to vector<2x4xf32>
    %12 = arith.divf %11, %10 : vector<2x4xf32>
    %c0_8 = arith.constant 0 : index
    %c0_9 = arith.constant 0 : index
    %13 = vector.load %arg3[%c0_8, %c0_9] : memref<2x4xf32, #tpu.memory_space<vmem>>, vector<2x4xf32>
    tpu.vector_store %arg3[%c0_8, %c0_9], %12 {strides = array<i32>} : memref<2x4xf32, #tpu.memory_space<vmem>>, vector<2x4xf32>,
    return
  }
}

module attributes {stable_mosaic.version = 11 : i64} {
  func.func @gate_mul_kernel(%arg0: i32, %arg1: i32, %arg2: memref<1x4x256xf32, #tpu.memory_space<vmem>>, %arg3: memref<1x4x1xf32, #tpu.memory_space<vmem>>, %arg4: memref<1x4x256xf32, #tpu.memory_space<vmem>>) attributes {dimension_semantics = [#tpu.dimension_semantics<parallel>, #tpu.dimension_semantics<parallel>], iteration_bounds = array<i64: 2, 1>, scalar_prefetch = 0 : i64, scratch_operands = 0 : i64, tpu.core_type = #tpu.core_type<tc>, window_params = [{transform_indices = @transform_0, window_bounds = array<i64: 1, 4, 256>}, {transform_indices = @transform_1, window_bounds = array<i64: 1, 4, 1>}, {transform_indices = @transform_2, window_bounds = array<i64: 1, 4, 256>}]} {
    %c0 = arith.constant 0 : index
    %c0_0 = arith.constant 0 : index
    %c0_1 = arith.constant 0 : index
    %0 = vector.load %arg2[%c0, %c0_0, %c0_1] : memref<1x4x256xf32, #tpu.memory_space<vmem>>, vector<1x4x256xf32>
    %1 = vector.shape_cast %0 : vector<1x4x256xf32> to vector<4x256xf32>
    %c0_2 = arith.constant 0 : index
    %c0_3 = arith.constant 0 : index
    %c0_4 = arith.constant 0 : index
    %2 = vector.load %arg3[%c0_2, %c0_3, %c0_4] : memref<1x4x1xf32, #tpu.memory_space<vmem>>, vector<1x4x1xf32>
    %3 = vector.shape_cast %2 : vector<1x4x1xf32> to vector<4x1xf32>
    %4 = vector.broadcast %3 : vector<4x1xf32> to vector<4x256xf32>
    %5 = arith.mulf %1, %4 : vector<4x256xf32>
    %c0_5 = arith.constant 0 : index
    %c0_6 = arith.constant 0 : index
    %c0_7 = arith.constant 0 : index
    %6 = vector.load %arg4[%c0_5, %c0_6, %c0_7] : memref<1x4x256xf32, #tpu.memory_space<vmem>>, vector<1x4x256xf32>
    %7 = vector.shape_cast %6 : vector<1x4x256xf32> to vector<4x256xf32>
    %8 = vector.shape_cast %5 : vector<4x256xf32> to vector<1x4x256xf32>
    tpu.vector_store %arg4[%c0_5, %c0_6, %c0_7], %8 {strides = array<i32>} : memref<1x4x256xf32, #tpu.memory_space<vmem>>, vector<1x4x256xf32>,
    return
  }
  func.func @transform_0(%arg0: i32, %arg1: i32) -> (i32, i32, i32) {
    %c0_i32 = arith.constant 0 : i32
    %c0_i32_0 = arith.constant 0 : i32
    return %arg0, %c0_i32, %arg1 : i32, i32, i32
  }
  func.func @transform_1(%arg0: i32, %arg1: i32) -> (i32, i32, i32) {
    %c0_i32 = arith.constant 0 : i32
    %c0_i32_0 = arith.constant 0 : i32
    %c0_i32_1 = arith.constant 0 : i32
    return %arg0, %c0_i32, %c0_i32_0 : i32, i32, i32
  }
  func.func @transform_2(%arg0: i32, %arg1: i32) -> (i32, i32, i32) {
    %c0_i32 = arith.constant 0 : i32
    %c0_i32_0 = arith.constant 0 : i32
    return %arg0, %c0_i32, %arg1 : i32, i32, i32
  }
}

</mosaic_0001>

<bundles_post_ra>
// kernel: se_layer.3
= control target key start
LH: loop header
LB: loop body
LE: loop exit
PB: predicated region body
PF: predicated region fallthrough
CT: control target
= control target key end

     0   :  { %s304_s6 = smov 0   ;;  %s306_s7 = smov 0   ;;  %s330_s0 = inlined_call_operand.vmem [shape: f32[2,4,256], index: 0, kind: input, shape index: {}]   ;;  %s331_s1 = inlined_call_operand.vmem [shape: f32[2,4,1], index: 1, kind: output, shape index: {}]  }
   0x1   :  { %s308_s8 = smov 0  }
   0x2 LB: > { %s23_s9 = sadd.s32 1, %s288_s7  ;;  %p238_p0 = scmp.ge.s32.totalorder %s292_s8, 1  ;;  %s292_s8 = sphi %s308_s8, %s11_s8   ;;  %s288_s7 = sphi %s306_s7, %s333_s7   ;;  %s284_s6 = sphi %s304_s6, %s332_s6  }
   0x3   : > { %p25_p1 = scmp.ge.s32.totalorder %s23_s9, 2  ;;  %p106_p2 = scmp.lt.s32.totalorder %s292_s8, 3 }
   0x5   : > { %s335_s9 = smov (%p25_p1, %s23_s9), 0  ;;  %p107_p3 = pnand %p238_p0, %p106_p2 }
   0x6   : > { %p130_p4 = scmp.lt.s32.totalorder (!%p107_p3), %s284_s6, 1 }
   0x7   : > { %110 = sbr.rel (%p107_p3) target bundleno = 160 (0xa0), region = 24 }
   0xc   : > { %s337_s6 = smov (!%p130_p4, %s284_s6), 1  ;;  %vm147_vm0 = vcmask 1043456   ;;  %vm157_vm1 = vcmask 3072  }
   0xd   : > { %s244_s10 = sshll.u32 %s337_s6, 3  ;;  %s241_s14 = sshll.u32 %s337_s6, 2 }
   0xe   : > { %s137_s13 = scalar_lea.vmem %s330_s0, %s244_s10  ;;  %s142_s17 = scalar_lea.vmem %s331_s1, %s241_s14 }
   0xf   : > { %v143_v0 = vld [vmem:[%s137_s13] sm:$0xff] }
  0x10   : > { %v145_v1 = vcombine.high %v143_v0, %v143_v0  ;;  %v148_v2 = vsel %vm147_vm0, %v143_v0, -inf }
  0x12   : > { %v149_v3 = vsel %vm147_vm0, %v145_v1, -inf }
  0x13   : > { %v150_v4 = vmax.f32 %v148_v2, %v149_v3 }
  0x15   : > { %151 = vmax.xlane.f32.xlu0 %v150_v4 }
  0x9e   : > { %v152_v5 = vpop.xlane.xlu0 %151 }
  0x9f   : > { %158 = vst.msk [vmem:[%s142_s17] sm:$0xf] %vm157_vm1, %v152_v5 }
  0xa0 PF: > { %s11_s8 = sadd.s32 1, %s292_s8   ;;  %s332_s6 = smov %s288_s7 }
  0xa1   : > { %p8_p5 = scmp.ge.s32.totalorder %s11_s8, 4   ;;  %s333_s7 = smov %s335_s9 }
  0xa3   :  { %10 = sbr.rel (!%p8_p5) target bundleno = 2 (0x2), region = 62 }

// kernel: se_layer.4
= control target key start
LH: loop header
LB: loop body
LE: loop exit
PB: predicated region body
PF: predicated region fallthrough
CT: control target
= control target key end

     0   :  { %vm27_vm0 = vcmask 1043456   ;;  %vm23_vm1 = vcmask 31744   ;;  %v129_v0 = vmov 0.0   ;;  %vm130_vm2 = vmmov 0   ;;  %s163_s1 = inlined_call_operand.vmem [shape: f32[4,4], index: 1, kind: input, shape index: {}]   ;;  %s164_s0 = inlined_call_operand.vmem [shape: f32[2,4], index: 0, kind: input, shape index: {}]   ;;  %s165_s2 = inlined_call_operand.vmem [shape: f32[1,4], index: 2, kind: input, shape index: {}]   ;;  %s166_s3 = inlined_call_operand.vmem [shape: f32[2,4], index: 3, kind: output, shape index: {}]  }
   0x1   :  { %118 = vmatprep.subr.mxu0 %v129_v0  ;;  %v15_v1 = vld [vmem:[%s163_s1] sm:$0xf]  ;;  %120 = vmatprep.mubr.msk.f32.mxu0 %vm130_vm2, %v129_v0  ;;  %vm107_vm3 = vcmask 25600  }
   0x2   :  { %v14_v2 = vld [vmem:[%s164_s0] sm:$0x3]  ;;  %119 = vmatpush3.msk.msra.mxu0 %vm27_vm0, %v15_v1 }
   0x3   :  { %121 = vmatmul.mubr.msk.f32.vlgmr.msra.gmra.mxu0 %vm23_vm1, %v14_v2  ;;  %v113_v3 = vld [vmem:[%s165_s2] ss:$0 sm:$0xff] }
  0xc3   :  { %v97_v4 = vpop.f32.mrf.mxu0 }
  0xc4   :  { %v98_v5 = vadd.f32 %v113_v3, %v97_v4 }
  0xc5   :  { %v122_v6 = vpop.f32.mrf.mxu0 }
  0xc6   :  { %v101_v7 = vsub.f32 0.0, %v98_v5 }
  0xc8   :  { %v102_v8 = vmul.f32 1.442695, %v101_v7 }
  0xca   :  { %125 = vpow2.f32 %v102_v8 }
  0xd7   :  { %v126_v9 = vpop.eup %125 }
  0xd8   :  { %v104_v10 = vadd.f32 1.0, %v126_v9 }
  0xda   :  { %127 = vrcp.f32 %v104_v10 }
  0xe7   :  { %v128_v11 = vpop.eup %127 }
  0xe8   :  { %108 = vst.msk [vmem:[%s166_s3] sm:$0x3] %vm107_vm3, %v128_v11 }

// kernel: se_layer.5
= control target key start
LH: loop header
LB: loop body
LE: loop exit
PB: predicated region body
PF: predicated region fallthrough
CT: control target
= control target key end

     0   :  { %s397_s9 = smov 0   ;;  %s399_s10 = smov 0   ;;  %s430_s0 = inlined_call_operand.vmem [shape: f32[2,4,256], index: 0, kind: input, shape index: {}, may-alias: {0,2}]   ;;  %s431_s1 = inlined_call_operand.vmem [shape: f32[2,4,1], index: 1, kind: input, shape index: {}]   ;;  %s432_s2 = inlined_call_operand.vmem [shape: f32[2,4,256], index: 2, kind: output, shape index: {}, may-alias: {0,2}]  }
   0x1   :  { %s401_s11 = smov 0  }
   0x2 LB: > { %s24_s12 = sadd.s32 1, %s374_s10  ;;  %p319_p0 = scmp.ge.s32.totalorder %s378_s11, 1  ;;  %s378_s11 = sphi %s401_s11, %s12_s11   ;;  %s374_s10 = sphi %s399_s10, %s434_s10   ;;  %s370_s9 = sphi %s397_s9, %s433_s9  }
   0x3   : > { %p26_p1 = scmp.ge.s32.totalorder %s24_s12, 2  ;;  %p142_p2 = scmp.lt.s32.totalorder %s378_s11, 3 }
   0x5   : > { %s436_s12 = smov (%p26_p1, %s24_s12), 0  ;;  %p143_p3 = pnand %p319_p0, %p142_p2 }
   0x6   : > { %p177_p4 = scmp.lt.s32.totalorder (!%p143_p3), %s370_s9, 1 }
   0x7   : > { %146 = sbr.rel (%p143_p3) target bundleno = 145 (0x91), region = 28 }
   0xc   : > { %v380_v0 = vmov 0   ;;  %s438_s9 = smov (!%p177_p4, %s370_s9), 1  ;;  %v381_v2 = vmov 839922192   ;;  %v209_v4 = vlaneseq }
   0xd   : > { %355 = vset.pattern.permute.xlu0 %v380_v0  ;;  %s322_s13 = sshll.u32 %s438_s9, 2  ;;  %v207_v3 = vunpack.c.l.s4 %v381_v2  ;;  %s327_s17 = sshll.u32 %s438_s9, 3 }
   0xe   : > { %s189_s16 = scalar_lea.vmem %s431_s1, %s322_s13  ;;  %v210_v6 = vshrl.u32 %v209_v4, 7  ;;  %s184_s20 = scalar_lea.vmem %s430_s0, %s327_s17 }
   0xf   : > { %v201_v1 = vld [vmem:[%s189_s16] sm:$0xf]  ;;  %v208_v5 = vunpack.c.0.s8 %v207_v3  ;;  %s198_s23 = scalar_lea.vmem %s432_s2, %s327_s17 }
  0x10   : > { %204 = vperm.xlu0 %355, %v201_v1   ;;  %v200_v9 = vld [vmem:[%s184_s20] sm:$0xff] }
  0x11   : > { %v211_v7 = vsub.s32 %v208_v5, %v210_v6 }
  0x8b   : > { %v205_v8 = vpop.permute.xlu0 %204 }
  0x8c   : > { %v212_v10 = vrot.slane %v205_v8, %v211_v7 }
  0x8e   : > { %v214_v11 = vmul.f32 %v212_v10, %v200_v9 }
  0x90   : > { %215 = vst [vmem:[%s198_s23] sm:$0xff] %v214_v11 }
  0x91 PF: > { %s12_s11 = sadd.s32 1, %s378_s11   ;;  %s433_s9 = smov %s374_s10 }
  0x92   : > { %p9_p5 = scmp.ge.s32.totalorder %s12_s11, 4   ;;  %s434_s10 = smov %s436_s12 }
  0x94   :  { %11 = sbr.rel (!%p9_p5) target bundleno = 2 (0x2), region = 61 }

</bundles_post_ra>
